<compile_context>
chip_gen: v7x
topology: tpu7x:2x2x1
jax: 0.10.0
libtpu: 0.0.40
codegen_flags: <defaults>
</compile_context>

<pallas_src>
import functools
import math

import jax
import jax.numpy as jnp
from jax.experimental import pallas as pl
from jax.experimental.pallas import tpu as pltpu


def _attention_head_kernel(
    q_ref, k_ref, v_ref,
    wq_ref, bq_ref,
    wk_ref, bk_ref,
    wv_ref, bv_ref,
    wo_ref, bo_ref,
    out_ref,
    *, seq_len, compute_dtype, approx_reciprocal,
):
    rows = q_ref.shape[0]              # = batches_per_block * seq_len
    nb = rows // seq_len
    cdt = compute_dtype                # MXU operand dtype (f32 or bf16)
    f32 = jnp.float32

    # ---- fused input projections: one (rows, d_model) MXU matmul each -------
    # Activations stay in their HBM dtype (f32) and are cast to the MXU dtype
    # only here; accumulation is f32.  1/sqrt(d_k) is pre-folded into wq/bq.
    qp = jnp.dot(q_ref[...].astype(cdt), wq_ref[...],
                 preferred_element_type=f32) + bq_ref[...]
    kp = jnp.dot(k_ref[...].astype(cdt), wk_ref[...],
                 preferred_element_type=f32) + bk_ref[...]
    vp = jnp.dot(v_ref[...].astype(cdt), wv_ref[...],
                 preferred_element_type=f32) + bv_ref[...]

    d_k = qp.shape[-1]
    d_v = vp.shape[-1]

    # (rows, d) -> (nb, S, d): f32 sublane-aligned split (S % 8 == 0).
    # NOTE: for the bf16 path, S a multiple of 16 keeps the per-batch score
    # tiles fully sublane-tile aligned (perf only, not required for S % 8 == 0).
    qb = qp.reshape(nb, seq_len, d_k).astype(cdt)
    kb = kp.reshape(nb, seq_len, d_k).astype(cdt)
    vb = vp.reshape(nb, seq_len, d_v).astype(cdt)

    # scores[b, i, j] = <q_b[i], k_b[j]>; contracting the last axes avoids an
    # explicit XLU transpose of kp.  Scale is already folded into wq/bq.
    scores = jnp.einsum("bqd,bkd->bqk", qb, kb, preferred_element_type=f32)
    # TODO(synk): optional `mask` argument of the PyTorch module not plumbed
    # through (this kernel implements the mask=None path); a mask must be
    # applied here, before the row max, to keep the stable softmax correct.

    # Numerically stable softmax, all in f32 (VPU/EUP).
    m = jnp.max(scores, axis=-1, keepdims=True)
    e = jnp.exp(scores - m)
    denom = jnp.sum(e, axis=-1, keepdims=True)
    probs = e * pl.reciprocal(denom, approx=approx_reciprocal)

    ctx = jnp.einsum("bqk,bkd->bqd", probs.astype(cdt), vb,
                     preferred_element_type=f32)            # (nb, S, d_v) f32

    # Output projection on the fused (rows, d_v) slab.
    out = jnp.dot(ctx.reshape(rows, d_v).astype(cdt), wo_ref[...],
                  preferred_element_type=f32) + bo_ref[...]
    out_ref[...] = out.astype(out_ref.dtype)


def _pick_batches_per_block(B, S, target_block_rows):
    """Largest whole-batch block <= target rows, with >=2 (prefer even) grid steps."""
    cap = max(1, min(B, target_block_rows // max(S, 1)))
    if B >= 2:
        cap = min(cap, B // 2)      # >= 2 grid steps: pipelining + dual-TC on v7x
    cap = max(cap, 1)
    divisors = [bb for bb in range(1, cap + 1) if B % bb == 0]
    even = [bb for bb in divisors if (B // bb) % 2 == 0]
    return max(even) if even else max(divisors)


def attention_head_forward(q, k, v, params, *,
                           compute_dtype=jnp.bfloat16,
                           out_dtype=jnp.float32,
                           approx_reciprocal=True,
                           target_block_rows=512,
                           vmem_limit_bytes=40 * 1024 * 1024):
    """q, k, v: (B, S, d_model). params: (in, out)-layout weights / (1, out) biases."""
    B, S, d_model = q.shape
    d_k = params["wq"].shape[1]
    d_v = params["wv"].shape[1]
    if S % 8 != 0:
        # TODO(synk): non-multiple-of-8 sequence lengths need key masking.
        raise NotImplementedError("sequence length must be a multiple of 8")

    rows = B * S
    bb = _pick_batches_per_block(B, S, target_block_rows)
    rows_per_block = bb * S
    n_blocks = B // bb

    # Activations go to the kernel unpadded and uncast: (B, S, D) -> (B*S, D)
    # is a contiguous, layout-preserving reshape (no HBM traffic).
    q2 = q.reshape(rows, d_model)
    k2 = k.reshape(rows, d_model)
    v2 = v.reshape(rows, d_model)

    # Fold 1/sqrt(d_k) into the q projection (exact); cast weights to the MXU
    # dtype once (tiny vs. activations).  Biases stay f32: added to f32 accs.
    inv_sqrt_dk = 1.0 / math.sqrt(float(d_k))
    cast_w = lambda w: w.astype(compute_dtype)
    wq = cast_w(params["wq"] * inv_sqrt_dk)
    bq = (params["bq"] * inv_sqrt_dk).astype(jnp.float32)
    wk = cast_w(params["wk"]); bk = params["bk"].astype(jnp.float32)
    wv = cast_w(params["wv"]); bv = params["bv"].astype(jnp.float32)
    wo = cast_w(params["wo"]); bo = params["bo"].astype(jnp.float32)

    kernel = functools.partial(
        _attention_head_kernel,
        seq_len=S,
        compute_dtype=compute_dtype,
        approx_reciprocal=approx_reciprocal,
    )

    row_spec = pl.BlockSpec((rows_per_block, d_model), lambda g: (g, 0))
    # Grid-invariant weights/biases: constant index_map + single buffer (their
    # block index never changes, so double-buffering only wastes VMEM).
    const = lambda shape: pl.BlockSpec(shape, lambda g: (0, 0),
                                       pipeline_mode=pl.Buffered(1))

    c_itemsize = jnp.dtype(compute_dtype).itemsize
    flops = (2 * rows * d_model * (2 * d_k + d_v)       # input projections
             + 2 * B * S * S * (d_k + d_v)              # scores + ctx
             + 2 * rows * d_v * d_model)                # output projection
    transcendentals = B * S * S + B * S                 # exp + reciprocal
    bytes_accessed = (
        3 * rows * d_model * q.dtype.itemsize                          # q, k, v
        + (d_model * (2 * d_k + d_v) + d_v * d_model) * c_itemsize     # weights
        + (2 * d_k + d_v + d_model) * 4                                # biases
        + rows * d_model * jnp.dtype(out_dtype).itemsize)              # output

    out2 = pl.pallas_call(
        kernel,
        out_shape=jax.ShapeDtypeStruct((rows, d_model), out_dtype),
        grid_spec=pltpu.PrefetchScalarGridSpec(
            num_scalar_prefetch=0,
            grid=(n_blocks,),
            in_specs=[
                row_spec, row_spec, row_spec,                    # q, k, v
                const((d_model, d_k)), const((1, d_k)),          # wq, bq
                const((d_model, d_k)), const((1, d_k)),          # wk, bk
                const((d_model, d_v)), const((1, d_v)),          # wv, bv
                const((d_v, d_model)), const((1, d_model)),      # wo, bo
            ],
            out_specs=row_spec,
        ),
        compiler_params=pltpu.CompilerParams(
            dimension_semantics=("parallel",),   # shards row blocks across TCs
            vmem_limit_bytes=vmem_limit_bytes,
        ),
        cost_estimate=pl.CostEstimate(
            flops=int(flops),
            transcendentals=int(transcendentals),
            bytes_accessed=int(bytes_accessed),
        ),
    )(q2, k2, v2, wq, bq, wk, bk, wv, bv, wo, bo)

    return out2.reshape(B, S, d_model)


def _reference_forward(q, k, v, params, d_k):
    """Plain-JAX reference mirroring the PyTorch forward (mask=None)."""
    qp = q @ params["wq"] + params["bq"]
    kp = k @ params["wk"] + params["bk"]
    vp = v @ params["wv"] + params["bv"]
    scores = (qp @ jnp.swapaxes(kp, -1, -2)) / jnp.sqrt(jnp.float32(d_k))
    probs = jax.nn.softmax(scores, axis=-1)
    ctx = probs @ vp
    return ctx @ params["wo"] + params["bo"]


def _init_params(key, d_model, d_k, d_v):
    """Deterministic init. Weights stored as (in, out) = W.T of torch Linear."""
    keys = jax.random.split(key, 8)

    def linear(kw, kb, fan_in, fan_out):
        bound = 1.0 / math.sqrt(fan_in)
        w = jax.random.uniform(kw, (fan_in, fan_out), jnp.float32, -bound, bound)
        b = jax.random.uniform(kb, (1, fan_out), jnp.float32, -bound, bound)
        return w, b

    wq, bq = linear(keys[0], keys[1], d_model, d_k)
    wk, bk = linear(keys[2], keys[3], d_model, d_k)
    wv, bv = linear(keys[4], keys[5], d_model, d_v)
    wo, bo = linear(keys[6], keys[7], d_v, d_model)
    return {"wq": wq, "bq": bq, "wk": wk, "bk": bk,
            "wv": wv, "bv": bv, "wo": wo, "bo": bo}


if __name__ == "__main__":
    B, S, d_model, d_k, d_v = 2, 8, 32, 16, 16

    root = jax.random.PRNGKey(0)
    k_in, k_params = jax.random.split(root)
    kq, kk, kv = jax.random.split(k_in, 3)

    q = jax.random.normal(kq, (B, S, d_model), jnp.float32)
    k = jax.random.normal(kk, (B, S, d_model), jnp.float32)
    v = jax.random.normal(kv, (B, S, d_model), jnp.float32)

    params = _init_params(k_params, d_model, d_k, d_v)
    ref = _reference_forward(q, k, v, params, d_k)

    # 1) f32 MXU operands + exact reciprocal: strict numerical validation.
    out_f32 = jax.block_until_ready(
        attention_head_forward(q, k, v, params,
                               compute_dtype=jnp.float32,
                               approx_reciprocal=False))
    assert out_f32.shape == (B, S, d_model)
    assert jnp.allclose(out_f32, ref, atol=1e-4, rtol=1e-4), (
        float(jnp.max(jnp.abs(out_f32 - ref))))

    # 2) bf16 MXU operands + approx (EUP) reciprocal: production default path.
    out_bf16 = jax.block_until_ready(
        attention_head_forward(q, k, v, params,
                               compute_dtype=jnp.bfloat16,
                               approx_reciprocal=True))
    assert out_bf16.shape == (B, S, d_model)
    assert jnp.allclose(out_bf16, ref, atol=5e-2, rtol=5e-2), (
        float(jnp.max(jnp.abs(out_bf16 - ref))))

    print("KERNEL_OK")
</pallas_src>

<mosaic_0001>
module attributes {stable_mosaic.version = 11 : i64} {
  func.func @_attention_head_kernel(%arg0: i32, %arg1: memref<8x32xf32, #tpu.memory_space<vmem>>, %arg2: memref<8x32xf32, #tpu.memory_space<vmem>>, %arg3: memref<8x32xf32, #tpu.memory_space<vmem>>, %arg4: memref<32x16xf32, #tpu.memory_space<vmem>>, %arg5: memref<1x16xf32, #tpu.memory_space<vmem>>, %arg6: memref<32x16xf32, #tpu.memory_space<vmem>>, %arg7: memref<1x16xf32, #tpu.memory_space<vmem>>, %arg8: memref<32x16xf32, #tpu.memory_space<vmem>>, %arg9: memref<1x16xf32, #tpu.memory_space<vmem>>, %arg10: memref<16x32xf32, #tpu.memory_space<vmem>>, %arg11: memref<1x32xf32, #tpu.memory_space<vmem>>, %arg12: memref<8x32xf32, #tpu.memory_space<vmem>>) attributes {dimension_semantics = [#tpu.dimension_semantics<parallel>], iteration_bounds = array<i64: 2>, scalar_prefetch = 0 : i64, scratch_operands = 0 : i64, tpu.core_type = #tpu.core_type<tc>, window_params = [{transform_indices = @transform_0, window_bounds = array<i64: 8, 32>}, {transform_indices = @transform_1, window_bounds = array<i64: 8, 32>}, {transform_indices = @transform_2, window_bounds = array<i64: 8, 32>}, {pipeline_mode = #tpu.pipeline_mode<synchronous>, transform_indices = @transform_3, window_bounds = array<i64: 32, 16>}, {pipeline_mode = #tpu.pipeline_mode<synchronous>, transform_indices = @transform_4, window_bounds = array<i64: 1, 16>}, {pipeline_mode = #tpu.pipeline_mode<synchronous>, transform_indices = @transform_5, window_bounds = array<i64: 32, 16>}, {pipeline_mode = #tpu.pipeline_mode<synchronous>, transform_indices = @transform_6, window_bounds = array<i64: 1, 16>}, {pipeline_mode = #tpu.pipeline_mode<synchronous>, transform_indices = @transform_7, window_bounds = array<i64: 32, 16>}, {pipeline_mode = #tpu.pipeline_mode<synchronous>, transform_indices = @transform_8, window_bounds = array<i64: 1, 16>}, {pipeline_mode = #tpu.pipeline_mode<synchronous>, transform_indices = @transform_9, window_bounds = array<i64: 16, 32>}, {pipeline_mode = #tpu.pipeline_mode<synchronous>, transform_indices = @transform_10, window_bounds = array<i64: 1, 32>}, {transform_indices = @transform_11, window_bounds = array<i64: 8, 32>}]} {
    %c0 = arith.constant 0 : index
    %c0_0 = arith.constant 0 : index
    %0 = vector.load %arg1[%c0, %c0_0] : memref<8x32xf32, #tpu.memory_space<vmem>>, vector<8x32xf32>
    %c0_1 = arith.constant 0 : index
    %c0_2 = arith.constant 0 : index
    %1 = vector.load %arg4[%c0_1, %c0_2] : memref<32x16xf32, #tpu.memory_space<vmem>>, vector<32x16xf32>
    %cst = arith.constant dense<0.000000e+00> : vector<8x16xf32>
    %2 = tpu.matmul %0, %1, %cst {dimension_numbers = #tpu.dot_dimension_numbers<[1], [0], [0], [1], [0, 0, 1, 1], [], []>} : vector<8x32xf32>, vector<32x16xf32>, vector<8x16xf32> -> vector<8x16xf32>
    %c0_3 = arith.constant 0 : index
    %c0_4 = arith.constant 0 : index
    %3 = vector.load %arg5[%c0_3, %c0_4] : memref<1x16xf32, #tpu.memory_space<vmem>>, vector<1x16xf32>
    %4 = vector.broadcast %3 : vector<1x16xf32> to vector<8x16xf32>
    %5 = arith.addf %2, %4 : vector<8x16xf32>
    %c0_5 = arith.constant 0 : index
    %c0_6 = arith.constant 0 : index
    %6 = vector.load %arg2[%c0_5, %c0_6] : memref<8x32xf32, #tpu.memory_space<vmem>>, vector<8x32xf32>
    %c0_7 = arith.constant 0 : index
    %c0_8 = arith.constant 0 : index
    %7 = vector.load %arg6[%c0_7, %c0_8] : memref<32x16xf32, #tpu.memory_space<vmem>>, vector<32x16xf32>
    %cst_9 = arith.constant dense<0.000000e+00> : vector<8x16xf32>
    %8 = tpu.matmul %6, %7, %cst_9 {dimension_numbers = #tpu.dot_dimension_numbers<[1], [0], [0], [1], [0, 0, 1, 1], [], []>} : vector<8x32xf32>, vector<32x16xf32>, vector<8x16xf32> -> vector<8x16xf32>
    %c0_10 = arith.constant 0 : index
    %c0_11 = arith.constant 0 : index
    %9 = vector.load %arg7[%c0_10, %c0_11] : memref<1x16xf32, #tpu.memory_space<vmem>>, vector<1x16xf32>
    %10 = vector.broadcast %9 : vector<1x16xf32> to vector<8x16xf32>
    %11 = arith.addf %8, %10 : vector<8x16xf32>
    %c0_12 = arith.constant 0 : index
    %c0_13 = arith.constant 0 : index
    %12 = vector.load %arg3[%c0_12, %c0_13] : memref<8x32xf32, #tpu.memory_space<vmem>>, vector<8x32xf32>
    %c0_14 = arith.constant 0 : index
    %c0_15 = arith.constant 0 : index
    %13 = vector.load %arg8[%c0_14, %c0_15] : memref<32x16xf32, #tpu.memory_space<vmem>>, vector<32x16xf32>
    %cst_16 = arith.constant dense<0.000000e+00> : vector<8x16xf32>
    %14 = tpu.matmul %12, %13, %cst_16 {dimension_numbers = #tpu.dot_dimension_numbers<[1], [0], [0], [1], [0, 0, 1, 1], [], []>} : vector<8x32xf32>, vector<32x16xf32>, vector<8x16xf32> -> vector<8x16xf32>
    %c0_17 = arith.constant 0 : index
    %c0_18 = arith.constant 0 : index
    %15 = vector.load %arg9[%c0_17, %c0_18] : memref<1x16xf32, #tpu.memory_space<vmem>>, vector<1x16xf32>
    %16 = vector.broadcast %15 : vector<1x16xf32> to vector<8x16xf32>
    %17 = arith.addf %14, %16 : vector<8x16xf32>
    %18 = vector.shape_cast %5 : vector<8x16xf32> to vector<1x8x16xf32>
    %19 = vector.shape_cast %11 : vector<8x16xf32> to vector<1x8x16xf32>
    %20 = vector.shape_cast %17 : vector<8x16xf32> to vector<1x8x16xf32>
    "tpu.trace_start"() <{level = 10 : i32, message = "bqd,bkd->bqk"}> : () -> ()
    %cst_19 = arith.constant dense<0.000000e+00> : vector<1x8x8xf32>
    %21 = tpu.matmul %18, %19, %cst_19 {dimension_numbers = #tpu.dot_dimension_numbers<[2], [2], [1], [1], [0, 0, 0, 1, 1, 1], [0], [0]>} : vector<1x8x16xf32>, vector<1x8x16xf32>, vector<1x8x8xf32> -> vector<1x8x8xf32>
    "tpu.trace_stop"() : () -> ()
    %cst_20 = arith.constant dense<0xFF800000> : vector<1x8xf32>
    %22 = vector.multi_reduction <maximumf>, %21, %cst_20 [2] : vector<1x8x8xf32> to vector<1x8xf32>
    %23 = vector.shape_cast %22 : vector<1x8xf32> to vector<1x8x1xf32>
    %24 = vector.broadcast %23 : vector<1x8x1xf32> to vector<1x8x8xf32>
    %25 = arith.subf %21, %24 : vector<1x8x8xf32>
    %26 = math.exp %25 : vector<1x8x8xf32>
    %cst_21 = arith.constant dense<0.000000e+00> : vector<1x8xf32>
    %27 = vector.multi_reduction <add>, %26, %cst_21 [2] : vector<1x8x8xf32> to vector<1x8xf32>
    %28 = vector.shape_cast %27 : vector<1x8xf32> to vector<1x8x1xf32>
    %29 = tpu.reciprocal %28 : vector<1x8x1xf32> -> vector<1x8x1xf32>
    %30 = vector.broadcast %29 : vector<1x8x1xf32> to vector<1x8x8xf32>
    %31 = arith.mulf %26, %30 : vector<1x8x8xf32>
    "tpu.trace_start"() <{level = 10 : i32, message = "bqk,bkd->bqd"}> : () -> ()
    %cst_22 = arith.constant dense<0.000000e+00> : vector<1x8x16xf32>
    %32 = tpu.matmul %31, %20, %cst_22 {dimension_numbers = #tpu.dot_dimension_numbers<[2], [1], [1], [2], [0, 0, 0, 1, 1, 2], [0], [0]>} : vector<1x8x8xf32>, vector<1x8x16xf32>, vector<1x8x16xf32> -> vector<1x8x16xf32>
    "tpu.trace_stop"() : () -> ()
    %33 = vector.shape_cast %32 : vector<1x8x16xf32> to vector<8x16xf32>
    %c0_23 = arith.constant 0 : index
    %c0_24 = arith.constant 0 : index
    %34 = vector.load %arg10[%c0_23, %c0_24] : memref<16x32xf32, #tpu.memory_space<vmem>>, vector<16x32xf32>
    %cst_25 = arith.constant dense<0.000000e+00> : vector<8x32xf32>
    %35 = tpu.matmul %33, %34, %cst_25 {dimension_numbers = #tpu.dot_dimension_numbers<[1], [0], [0], [1], [0, 0, 1, 1], [], []>} : vector<8x16xf32>, vector<16x32xf32>, vector<8x32xf32> -> vector<8x32xf32>
    %c0_26 = arith.constant 0 : index
    %c0_27 = arith.constant 0 : index
    %36 = vector.load %arg11[%c0_26, %c0_27] : memref<1x32xf32, #tpu.memory_space<vmem>>, vector<1x32xf32>
    %37 = vector.broadcast %36 : vector<1x32xf32> to vector<8x32xf32>
    %38 = arith.addf %35, %37 : vector<8x32xf32>
    %c0_28 = arith.constant 0 : index
    %c0_29 = arith.constant 0 : index
    %39 = vector.load %arg12[%c0_28, %c0_29] : memref<8x32xf32, #tpu.memory_space<vmem>>, vector<8x32xf32>
    tpu.vector_store %arg12[%c0_28, %c0_29], %38 {strides = array<i32>} : memref<8x32xf32, #tpu.memory_space<vmem>>, vector<8x32xf32>,
    return
  }
  func.func @transform_0(%arg0: i32) -> (i32, i32) {
    %c0_i32 = arith.constant 0 : i32
    %c0_i32_0 = arith.constant 0 : i32
    return %arg0, %c0_i32 : i32, i32
  }
  func.func @transform_1(%arg0: i32) -> (i32, i32) {
    %c0_i32 = arith.constant 0 : i32
    %c0_i32_0 = arith.constant 0 : i32
    return %arg0, %c0_i32 : i32, i32
  }
  func.func @transform_2(%arg0: i32) -> (i32, i32) {
    %c0_i32 = arith.constant 0 : i32
    %c0_i32_0 = arith.constant 0 : i32
    return %arg0, %c0_i32 : i32, i32
  }
  func.func @transform_3(%arg0: i32) -> (i32, i32) {
    %c0_i32 = arith.constant 0 : i32
    %c0_i32_0 = arith.constant 0 : i32
    %c0_i32_1 = arith.constant 0 : i32
    return %c0_i32, %c0_i32_0 : i32, i32
  }
  func.func @transform_4(%arg0: i32) -> (i32, i32) {
    %c0_i32 = arith.constant 0 : i32
    %c0_i32_0 = arith.constant 0 : i32
    %c0_i32_1 = arith.constant 0 : i32
    return %c0_i32, %c0_i32_0 : i32, i32
  }
  func.func @transform_5(%arg0: i32) -> (i32, i32) {
    %c0_i32 = arith.constant 0 : i32
    %c0_i32_0 = arith.constant 0 : i32
    %c0_i32_1 = arith.constant 0 : i32
    return %c0_i32, %c0_i32_0 : i32, i32
  }
  func.func @transform_6(%arg0: i32) -> (i32, i32) {
    %c0_i32 = arith.constant 0 : i32
    %c0_i32_0 = arith.constant 0 : i32
    %c0_i32_1 = arith.constant 0 : i32
    return %c0_i32, %c0_i32_0 : i32, i32
  }
  func.func @transform_7(%arg0: i32) -> (i32, i32) {
    %c0_i32 = arith.constant 0 : i32
    %c0_i32_0 = arith.constant 0 : i32
    %c0_i32_1 = arith.constant 0 : i32
    return %c0_i32, %c0_i32_0 : i32, i32
  }
  func.func @transform_8(%arg0: i32) -> (i32, i32) {
    %c0_i32 = arith.constant 0 : i32
    %c0_i32_0 = arith.constant 0 : i32
    %c0_i32_1 = arith.constant 0 : i32
    return %c0_i32, %c0_i32_0 : i32, i32
  }
  func.func @transform_9(%arg0: i32) -> (i32, i32) {
    %c0_i32 = arith.constant 0 : i32
    %c0_i32_0 = arith.constant 0 : i32
    %c0_i32_1 = arith.constant 0 : i32
    return %c0_i32, %c0_i32_0 : i32, i32
  }
  func.func @transform_10(%arg0: i32) -> (i32, i32) {
    %c0_i32 = arith.constant 0 : i32
    %c0_i32_0 = arith.constant 0 : i32
    %c0_i32_1 = arith.constant 0 : i32
    return %c0_i32, %c0_i32_0 : i32, i32
  }
  func.func @transform_11(%arg0: i32) -> (i32, i32) {
    %c0_i32 = arith.constant 0 : i32
    %c0_i32_0 = arith.constant 0 : i32
    return %arg0, %c0_i32 : i32, i32
  }
}

</mosaic_0001>

<bundles_post_ra>
// kernel: tpu_custom_call.1
= control target key start
LH: loop header
LB: loop body
LE: loop exit
PB: predicated region body
PF: predicated region fallthrough
CT: control target
= control target key end

     0   :  { %s1485_s0 = inlined_call_operand.vmem [shape: f32[16,32], index: 0, kind: input, shape index: {}]   ;;  %s1486_s1 = inlined_call_operand.vmem [shape: f32[16,32], index: 1, kind: input, shape index: {}]   ;;  %s1487_s2 = inlined_call_operand.vmem [shape: f32[16,32], index: 2, kind: input, shape index: {}]   ;;  %s1488_s3 = inlined_call_operand.vmem [shape: f32[32,16], index: 3, kind: input, shape index: {}]   ;;  %s1489_s4 = inlined_call_operand.vmem [shape: f32[1,16], index: 4, kind: input, shape index: {}]   ;;  %s1490_s5 = inlined_call_operand.vmem [shape: f32[32,16], index: 5, kind: input, shape index: {}]   ;;  %s1491_s6 = inlined_call_operand.vmem [shape: f32[1,16], index: 6, kind: input, shape index: {}]   ;;  %s1492_s7 = inlined_call_operand.vmem [shape: f32[32,16], index: 7, kind: input, shape index: {}]   ;;  %s1493_s8 = inlined_call_operand.vmem [shape: f32[1,16], index: 8, kind: input, shape index: {}]   ;;  %s1494_s9 = inlined_call_operand.vmem [shape: f32[16,32], index: 9, kind: input, shape index: {}]   ;;  %s1495_s10 = inlined_call_operand.vmem [shape: f32[1,32], index: 10, kind: input, shape index: {}]   ;;  %s1496_s11 = inlined_call_operand.hbm [shape: f32[16,32], index: 11, kind: output, shape index: {}]  }
   0x1   :  { %1497 = sst [smem:[#allocation5_spill]] %s1485_s0 }
   0x2   :  { %16 = vsyncpa [#allocation3], 0 }
   0x3   :  { %18 = vsyncpa [#allocation3 + $0x1], 0  ;;  %s1304_s17 = smov 0   ;;  %s1306_s18 = smov 0  }
   0x4   :  { %s1308_s19 = smov 0   ;;  %s1310_s20 = smov 0  }
   0x5 LB: > { %s1325_s21 = sadd.s32 4294967295, %s1238_s20   ;;  %s1014_s22 = sadd.s32 4294967294, %s1238_s20   ;;  %s1238_s20 = sphi %s1310_s20, %s1504_s20   ;;  %s1234_s19 = sphi %s1308_s19, %s1503_s19   ;;  %s1230_s18 = sphi %s1306_s18, %s1502_s18   ;;  %s1226_s17 = sphi %s1304_s17, %s1501_s17  }
   0x6   : > { %s1329_s23 = sadd.s32 1, %s1238_s20   ;;  %s277_s24 = sadd.s32 1, %s1234_s19 }
   0x7   : > { %s274_s25 = ssub.s32 %s1238_s20, %s1329_s23  ;;  %p287_p0 = scmp.ne.s32.totalorder %s1234_s19, %s1230_s18 }
   0x8   : > { %p275_p1 = scmp.eq.s32.totalorder %s274_s25, 0  ;;  %p288_p2 = scmp.eq.s32.totalorder %s1325_s21, 1 }
   0x9   : > { %p293_p3 = scmp.ne.s32.totalorder %s1230_s18, %s1226_s17  ;;  %p294_p4 = scmp.eq.s32.totalorder %s1014_s22, 1 }
   0xa   : > { %s1340_s26 = scalar_select %p275_p1, %s1234_s19, %s277_s24  }
   0xb   : > { %p1342_p5 = por %p288_p2, %p287_p0  ;;  %p1346_p6 = por %p294_p4, %p293_p3 }
   0xc   : > { %p1017_p7 = scmp.ge.s32.totalorder %s1238_s20, 1  ;;  %p357_p8 = scmp.lt.s32.totalorder %s1238_s20, 3 }
   0xe   : > { %p358_p9 = pnand %p1017_p7, %p357_p8 }
   0xf   : > { %v503_v0 = vld [vmem:[%s1490_s5] sm:$0xff] (!%p358_p9)  ;;  %v504_v1 = vld [vmem:[%s1490_s5 + $0x8] sm:$0xff] (!%p358_p9)  ;;  %v1240_v3 = vmov (!%p358_p9), 0.0|0.0   ;;  %v505_v6 = vld [vmem:[%s1490_s5 + $0x10] sm:$0xff] (!%p358_p9)  ;;  %p404_p10 = scmp.lt.s32.totalorder (!%p358_p9), %s1325_s21, 1  ;;  %vm1241_vm0 = vmmov (!%p358_p9), 0  }
  0x10   : > { %361 = sbr.rel (%p358_p9) target bundleno = 1211 (0x4bb), region = 64  ;;  %v417_v2 = vld [vmem:[%s1488_s3] sm:$0xff] (!%p358_p9)  ;;  %1115 = vmatprep.subr.bf16.mxu1 (!%p358_p9), %v1240_v3  ;;  %v1116_v4 = vpack.c.bf16 (!%p358_p9), %v504_v1, %v503_v0  ;;  %1109 = vmatprep.subr.bf16.mxu0 (!%p358_p9), %v1240_v3  ;;  %v418_v5 = vld [vmem:[%s1488_s3 + $0x8] sm:$0xff] (!%p358_p9)  ;;  %v506_v7 = vld [vmem:[%s1490_s5 + $0x18] sm:$0xff] (!%p358_p9)  ;;  %v1242_v9 = vmov (!%p358_p9), 0.0   ;;  %s1500_s0 = sld [smem:[#allocation5_spill]] (!%p358_p9) }
  0x11   : > { %v1110_v8 = vpack.c.bf16 (!%p358_p9), %v418_v5, %v417_v2  ;;  %1078 = vmatprep.mubr.msk.f32.mxu1 (!%p358_p9), %vm1241_vm0, %v1242_v9  ;;  %v419_v10 = vld [vmem:[%s1488_s3 + $0x10] sm:$0xff] (!%p358_p9)  ;;  %v420_v11 = vld [vmem:[%s1488_s3 + $0x18] sm:$0xff] (!%p358_p9)  ;;  %1067 = vmatprep.mubr.msk.f32.mxu0 (!%p358_p9), %vm1241_vm0, %v1242_v9  ;;  %v1119_v12 = vpack.c.bf16 (!%p358_p9), %v506_v7, %v505_v6  ;;  %vm428_vm1 = vcmask (!%p358_p9), 261120   ;;  %v1024_v16 = vld [vmem:[%s1491_s6] ss:$0 sm:$0xff] (!%p358_p9)  ;;  %vm672_vm2 = vcmask (!%p358_p9), 130048  }
  0x12   : > { %1117 = vmatpush3.bf16.msra.mxu1 (!%p358_p9), %v1116_v4  ;;  %v1113_v13 = vpack.c.bf16 (!%p358_p9), %v420_v11, %v419_v10  ;;  %v1022_v17 = vld [vmem:[%s1489_s4] ss:$0 sm:$0xff] (!%p358_p9)  ;;  %v589_v25 = vld [vmem:[%s1492_s7 + $0x8] sm:$0xff] (!%p358_p9)  ;;  %v590_v26 = vld [vmem:[%s1492_s7 + $0x10] sm:$0xff] (!%p358_p9)  ;;  %vm749_vm3 = vcmask (!%p358_p9), 64512   ;;  %s401_s14 = sand.u32 (!%p358_p9), 1, %s1230_s18  }
  0x13   : > { %1111 = vmatpush3.bf16.msra.mxu0 (!%p358_p9), %v1110_v8  ;;  %1118 = vmatprep.subr.bf16.mxu1 (!%p358_p9), %v1240_v3  ;;  %v588_v24 = vld [vmem:[%s1492_s7] sm:$0xff] (!%p358_p9)  ;;  %v591_v28 = vld [vmem:[%s1492_s7 + $0x18] sm:$0xff] (!%p358_p9)  ;;  %v835_v44 = vld [vmem:[%s1494_s9 + $0x8] sm:$0xff] (!%p358_p9)  ;;  %s1018_s15 = sshll.u32 (!%p358_p9), %s401_s14, 3 }
  0x14   : > { %1112 = vmatprep.subr.bf16.mxu0 (!%p358_p9), %v1240_v3  ;;  %v1122_v27 = vpack.c.bf16 (!%p358_p9), %v589_v25, %v588_v24  ;;  %v1125_v29 = vpack.c.bf16 (!%p358_p9), %v591_v28, %v590_v26  ;;  %v1026_v40 = vld [vmem:[%s1493_s8] ss:$0 sm:$0xff] (!%p358_p9) }
  0x15   : > { %v834_v43 = vld [vmem:[%s1494_s9] sm:$0xff] (!%p358_p9) }
  0x16   : > { %1120 = vmatpush3.bf16.msra.mxu1 (!%p358_p9), %v1119_v12  ;;  %v1128_v45 = vpack.c.bf16 (!%p358_p9), %v835_v44, %v834_v43  ;;  %v1031_v51 = vld [vmem:[%s1495_s10] ss:$0 sm:$0xff] (!%p358_p9) }
  0x17   : > { %s405_s16 = scalar_select %p404_p10, %s1325_s21, 1  ;;  %1114 = vmatpush3.bf16.msra.mxu0 %v1113_v13  ;;  %1092 = vmatprep.subr.mxu1 %v1242_v9 }
  0x18   : > { %1121 = vmatprep.subr.bf16.mxu0 %v1240_v3 }
  0x19   : > { %s1380_s22 = sshll.u32 %s405_s16, 3 }
  0x1a   : > { %s411_s29 = scalar_lea.vmem %s1486_s1, %s1380_s22  ;;  %s407_s13 = scalar_lea.vmem %s1500_s0, %s1380_s22 }
  0x1b   : > { %v502_v14 = vld [vmem:[%s411_s29] sm:$0xff]  ;;  %s415_s25 = scalar_lea.vmem %s1487_s2, %s1380_s22  ;;  %s403_s0 = scalar_lea.vmem [#allocation2], %s1018_s15 }
  0x1c   : > { %v416_v15 = vld [vmem:[%s407_s13] sm:$0xff]  ;;  %1079 = vmatmul.mubr.msk.f32.vlgmr.msra.gmra.mrb[0].mxu1 %vm428_vm1, %v502_v14  ;;  %s931_s22 = sshll.u32 %s403_s0, 4  ;;  %s918_s13 = scalar_lea.sflag [#allocation3], %s401_s14  ;;  %s1444_s22 = int_to_ptr.vmem [resolvable:$true] %s931_s22 }
  0x1d   : > { %1068 = vmatmul.mubr.msk.f32.vlgmr.msra.gmra.mrb[0].mxu0 %vm428_vm1, %v416_v15  ;;  %1094 = vmatprep.mubr.msk.f32.mxu1 %vm1241_vm0, %v1242_v9  ;;  %v587_v30 = vld [vmem:[%s415_s25] sm:$0xff]  ;;  %s1034_s25 = sshll.u32 %s1325_s21, 7  ;;  %s1176_s16 = scalar_lea.vmem %s1444_s22, 128 }
  0x1e   : > { %1089 = vmatprep.mubr.msk.f32.mxu0 %vm1241_vm0, %v1242_v9  ;;  %1123 = vmatpush3.bf16.msra.mxu0 %v1122_v27  ;;  %s1442_s12 = scalar_lea.hbm %s1496_s11, %s1034_s25  ;;  %p1177_p11 = scmp.ne.s32.totalorder %s1444_s22, %s1176_s16 }
  0x1f   : > { %1124 = vmatprep.subr.bf16.mxu0 %v1240_v3  ;;  %s1243_s21 = smov [#allocation2]  }
  0x20   : > { %p1178_p12 = pnand %p1177_p11, %p1342_p5  ;;  %s1180_s15 = sshll.u32 %s1243_s21, 4  ;;  %s1181_s15 = int_to_ptr.vmem [resolvable:$false] %s1180_s15 }
  0x21   : > { %s1182_s24 = scalar_lea.vmem %s1181_s15, 256  ;;  %p1183_p0 = scmp.lt.s32.totalorder %s1444_s22, %s1181_s15 }
  0x22   : > { %1126 = vmatpush3.bf16.msra.mxu0 %v1125_v29  ;;  %p1179_p13 = pneg %p1178_p12  ;;  %p1184_p1 = scmp.lt.s32.totalorder %s1182_s24, %s1176_s16 }
  0x23   : > { %1127 = vmatprep.subr.bf16.mxu0 %v1240_v3 }
  0x24   : > { %p1185_p2 = por %p1184_p1, %p1183_p0 }
  0x25   : > { %1090 = vmatmul.mubr.msk.f32.vlgmr.msra.gmra.mrb[2].mxu0 %vm428_vm1, %v587_v30 }
  0x26   : > { %1106 = vmatprep.mubr.msk.f32.mxu0 %vm1241_vm0, %v1242_v9  ;;  %1129 = vmatpush3.bf16.msra.mxu0 %v1128_v45  ;;  %p1186_p3 = pnand %p1185_p2, %p1179_p13 }
  0xef   : > { %v583_v18 = vpop.f32.mrb[0].mxu1 }
  0xf0   : > { %v584_v19 = vadd.f32 %v1024_v16, %v583_v18  ;;  %v1080_v20 = vpop.f32.mrb[1].mxu1  ;;  %v498_v21 = vpop.f32.mrb[0].mxu0 }
  0xf1   : > { %v499_v22 = vadd.f32 %v1022_v17, %v498_v21  ;;  %v1069_v23 = vpop.f32.mrb[1].mxu0 }
  0xf2   : > { %1093 = vmatpush3.xpose.msk.msra.mxu1 %vm672_vm2, %v584_v19 }
  0xf3   : > { %1097 = vmatprep.subr.mxu1 %v1242_v9 }
  0xf5   : > { %1095 = vmatmul.mubr.msk.f32.vlgmr.msra.gmra.mrb[2].mxu1 %vm672_vm2, %v499_v22 }
  0xf6   : > { %1099 = vmatprep.mubr.msk.f32.mxu1 %vm1241_vm0, %v1242_v9 }
  0xf8   : > { %v668_v39 = vpop.f32.mrb[2].mxu0 }
  0xf9   : > { %v1091_v41 = vpop.f32.mrb[3].mxu0  ;;  %v669_v42 = vadd.f32 %v1026_v40, %v668_v39 }
  0xfb   : > { %1098 = vmatpush3.msra.mxu1 %v669_v42 }
 0x1c8   : > { %v745_v31 = vpop.f32.mrb[2].mxu1 }
 0x1c9   : > { %v1096_v32 = vpop.f32.mrb[3].mxu1  ;;  %v750_v33 = vsel %vm749_vm3, %v745_v31, -inf }
 0x1ca   : > { %751 = vmax.xlane.f32.xlu0 %v750_v33 }
 0x257   : > { %v752_v34 = vpop.xlane.xlu0 %751 }
 0x258   : > { %v753_v35 = vsub.f32 %v745_v31, %v752_v34 }
 0x25a   : > { %v754_v36 = vmul.f32 1.442695, %v753_v35 }
 0x25c   : > { %1172 = vpow2.f32 %v754_v36 }
 0x266   : > { %v1173_v37 = vpop.eup %1172 }
 0x267   : > { %v756_v38 = vsel %vm749_vm3, %v1173_v37, 0.0 }
 0x268   : > { %757 = vadd.xlane.f32.xlu0 %v756_v38 }
 0x2f5   : > { %v758_v46 = vpop.xlane.xlu0 %757 }
 0x2f6   : > { %1174 = vrcp.f32 %v758_v46 }
 0x300   : > { %v1175_v47 = vpop.eup %1174 }
 0x301   : > { %v760_v48 = vmul.f32 %v1175_v47, %v1173_v37 }
 0x303   : > { %1100 = vmatmul.mubr.msk.f32.vlgmr.msra.gmra.mrb[4].mxu1 %vm749_vm3, %v760_v48 }
 0x3d6   : > { %v830_v49 = vpop.f32.mrb[4].mxu1 }
 0x3d7   : > { %v1101_v50 = vpop.f32.mrb[5].mxu1  ;;  %1107 = vmatmul.mubr.msk.f32.vlgmr.msra.gmra.mrb[4].mxu0 %vm672_vm2, %v830_v49 }
 0x4aa   : > { %v912_v52 = vpop.f32.mrb[4].mxu0 }
 0x4ab   : > { %v913_v53 = vadd.f32 %v1031_v51, %v912_v52  ;;  %v1108_v54 = vpop.f32.mrb[5].mxu0 }
 0x4ad   : > { %916 = vst.msk [vmem:[%s403_s0] sm:$0xff] %vm428_vm1, %v913_v53 }
 0x4ae   : > { %1189 = shalt.err (!%p1186_p3)
}
 0x4af   : > { %s1190_s14 = scalar_lea.hbm %s1442_s12, 128  ;;  %s1194_s29 = scalar_lea.hbm %s1496_s11, 256 }
 0x4b0   : > { %p1191_p4 = scmp.ne.s32.totalorder %s1442_s12, %s1190_s14  ;;  %p1195_p9 = scmp.lt.u32.totalorder %s1442_s12, %s1496_s11 }
 0x4b1   : > { %p1196_p10 = scmp.lt.u32.totalorder %s1194_s29, %s1190_s14  ;;  %p1198_p12 = scmp.lt.u32.totalorder %s1190_s14, %s1442_s12 }
 0x4b2   : > { %p1192_p7 = pnand %p1191_p4, %p1342_p5 }
 0x4b3   : > { %p1197_p11 = por %p1196_p10, %p1195_p9 }
 0x4b4   : > { %p1193_p8 = pneg %p1192_p7 }
 0x4b5   : > { %p1199_p13 = por %p1198_p12, %p1197_p11 }
 0x4b7   : > { %p1200_p0 = pnand %p1199_p13, %p1193_p8 }
 0x4b9   : > { %1203 = shalt.err (!%p1200_p0)
}
 0x4ba   : > { %1130 = dma.vmem_to_hbm [thread:$0]  (%p1342_p5), %s1444_s22, 128, %s1442_s12, %s918_s13  }
 0x4bb PF: > { %p1136_p1 = scmp.ge.s32.totalorder %s1238_s20, 2  ;;  %s943_s16 = sand.u32 1, %s1226_s17  }
 0x4bc   : > { %s944_s15 = scalar_lea.sflag [#allocation3], %s943_s16 }
 0x4bd   : > { %p1133_p2 = pnand %p1136_p1, %p1346_p6 }
 0x4bf   : > { %1221 = dma.done.wait (!%p1133_p2), %s944_s15, 128  }
 0x4c0   : > { %1223 = vsyncadd (!%p1133_p2), %s944_s15, 4294967168  ;;  %p21_p3 = scmp.ge.s32.totalorder %s1329_s23, 4   ;;  %s1501_s17 = smov %s1230_s18 }
 0x4c1   : > { %s1502_s18 = smov %s1234_s19  ;;  %s1503_s19 = smov %s1340_s26 }
 0x4c2   : > { %s1504_s20 = smov %s1329_s23  ;;  %23 = sbr.rel (!%p21_p3) target bundleno = 5 (0x5), region = 105 }
 0x4c9   :  { %949 = vsyncpa [#allocation3], 1 }
 0x4ca   :  { %951 = vsyncpa [#allocation3 + $0x1], 1 }

</bundles_post_ra>
